<compile_context>
chip_gen: v6e
topology: v6e:2x2x1
jax: 0.10.0
libtpu: 0.0.40
codegen_flags: <defaults>
</compile_context>

<pallas_src>
import jax
import jax.numpy as jnp
from jax.experimental import pallas as pl
from jax.experimental.pallas import tpu as pltpu

_LANE = 128       # lane width (last dim of a vreg)
_SUBLANE = 8      # sublane count (second-to-last dim of a vreg)
_TILE_ROWS = 512  # 512*128*4B = 256 KiB per block per operand


def _add_kernel(a_ref, b_ref, o_ref):
    # Single wide contiguous slab in, single unmasked contiguous store out.
    o_ref[...] = a_ref[...] + b_ref[...]


def pallas_add(x540, x525):
    """Elementwise add (operator.add) of two equally-shaped tensors."""
    assert x540.shape == x525.shape and x540.dtype == x525.dtype
    orig_shape = x540.shape
    n = x540.size

    # Lane-dense, sublane-aligned 2D layout: (rows, 128) with rows % 8 == 0.
    rows = pl.cdiv(n, _LANE)
    rows = ((rows + _SUBLANE - 1) // _SUBLANE) * _SUBLANE

    if rows <= _TILE_ROWS:
        # Small input: one block covering the whole (padded) slab.
        tile_rows = rows
    else:
        # Large input: tile over rows and pipeline; pad rows to a tile multiple.
        tile_rows = _TILE_ROWS
        rows = ((rows + _TILE_ROWS - 1) // _TILE_ROWS) * _TILE_ROWS
    grid_rows = rows // tile_rows

    padded_n = rows * _LANE
    a = x540.reshape(-1)
    b = x525.reshape(-1)
    if padded_n != n:
        a = jnp.pad(a, (0, padded_n - n))
        b = jnp.pad(b, (0, padded_n - n))
    a = a.reshape(rows, _LANE)
    b = b.reshape(rows, _LANE)

    out = pl.pallas_call(
        _add_kernel,
        out_shape=jax.ShapeDtypeStruct((rows, _LANE), x540.dtype),
        grid_spec=pltpu.PrefetchScalarGridSpec(
            num_scalar_prefetch=0,
            grid=(grid_rows,),
            in_specs=[
                pl.BlockSpec((tile_rows, _LANE), lambda i: (i, 0)),
                pl.BlockSpec((tile_rows, _LANE), lambda i: (i, 0)),
            ],
            out_specs=pl.BlockSpec((tile_rows, _LANE), lambda i: (i, 0)),
        ),
        compiler_params=pltpu.CompilerParams(
            dimension_semantics=("parallel",),
        ),
    )(a, b)

    return out.reshape(-1)[:n].reshape(orig_shape)


if __name__ == "__main__":
    key = jax.random.PRNGKey(0)
    k1, k2 = jax.random.split(key)
    # Shapes consistent with the module: [1, 224, 14, 14]
    x525 = jax.random.normal(k1, (1, 224, 14, 14), dtype=jnp.float32)
    x540 = jax.random.normal(k2, (1, 224, 14, 14), dtype=jnp.float32)

    out = pallas_add(x540, x525)
    jax.block_until_ready(out)

    ref = x540 + x525
    assert out.shape == ref.shape
    assert jnp.allclose(out, ref, atol=1e-6), "mismatch vs reference"
    print("KERNEL_OK")
</pallas_src>

<mosaic_0001>
module attributes {stable_mosaic.version = 11 : i64} {
  func.func @_add_kernel(%arg0: i32, %arg1: memref<344x128xf32, #tpu.memory_space<vmem>>, %arg2: memref<344x128xf32, #tpu.memory_space<vmem>>, %arg3: memref<344x128xf32, #tpu.memory_space<vmem>>) attributes {dimension_semantics = [#tpu.dimension_semantics<parallel>], iteration_bounds = array<i64: 1>, scalar_prefetch = 0 : i64, scratch_operands = 0 : i64, tpu.core_type = #tpu.core_type<tc>, window_params = [{transform_indices = @transform_0, window_bounds = array<i64: 344, 128>}, {transform_indices = @transform_1, window_bounds = array<i64: 344, 128>}, {transform_indices = @transform_2, window_bounds = array<i64: 344, 128>}]} {
    %c0 = arith.constant 0 : index
    %c0_0 = arith.constant 0 : index
    %0 = vector.load %arg1[%c0, %c0_0] : memref<344x128xf32, #tpu.memory_space<vmem>>, vector<344x128xf32>
    %c0_1 = arith.constant 0 : index
    %c0_2 = arith.constant 0 : index
    %1 = vector.load %arg2[%c0_1, %c0_2] : memref<344x128xf32, #tpu.memory_space<vmem>>, vector<344x128xf32>
    %2 = arith.addf %0, %1 : vector<344x128xf32>
    %c0_3 = arith.constant 0 : index
    %c0_4 = arith.constant 0 : index
    %3 = vector.load %arg3[%c0_3, %c0_4] : memref<344x128xf32, #tpu.memory_space<vmem>>, vector<344x128xf32>
    tpu.vector_store %arg3[%c0_3, %c0_4], %2 {strides = array<i32>} : memref<344x128xf32, #tpu.memory_space<vmem>>, vector<344x128xf32>,
    return
  }
  func.func @transform_0(%arg0: i32) -> (i32, i32) {
    %c0_i32 = arith.constant 0 : i32
    %c0_i32_0 = arith.constant 0 : i32
    return %arg0, %c0_i32 : i32, i32
  }
  func.func @transform_1(%arg0: i32) -> (i32, i32) {
    %c0_i32 = arith.constant 0 : i32
    %c0_i32_0 = arith.constant 0 : i32
    return %arg0, %c0_i32 : i32, i32
  }
  func.func @transform_2(%arg0: i32) -> (i32, i32) {
    %c0_i32 = arith.constant 0 : i32
    %c0_i32_0 = arith.constant 0 : i32
    return %arg0, %c0_i32 : i32, i32
  }
}

</mosaic_0001>

<bundles_post_ra>
// kernel: tpu_custom_call.1
= control target key start
LH: loop header
LB: loop body
LE: loop exit
PB: predicated region body
PF: predicated region fallthrough
CT: control target
= control target key end

     0   :  { %7 = vsyncpa [#allocation3], 0  ;;  %s339_s0 = inlined_call_operand.hbm [shape: f32[344,128], index: 0, kind: input, shape index: {}]   ;;  %s340_s1 = inlined_call_operand.hbm [shape: f32[344,128], index: 1, kind: input, shape index: {}]   ;;  %s341_s2 = inlined_call_operand.hbm [shape: f32[344,128], index: 2, kind: output, shape index: {}]  }
   0x1   :  { %8 = vsyncpa [#allocation6], 0 }
   0x2   :  { %9 = vsyncpa [#allocation4], 0  ;;  %s301_s9 = smov [#allocation2]  }
   0x3   :  { %s15_s10 = sshll.u32 %s301_s9, 4  ;;  %s16_s10 = int_to_ptr.vmem [resolvable:$true] %s15_s10 }
   0x4   :  { %s243_s11 = scalar_lea.vmem %s16_s10, 5504  ;;  %p248_p1 = scmp.lt.s32.totalorder %s16_s10, %s16_s10 }
   0x5   :  { %p244_p0 = scmp.ne.s32.totalorder %s16_s10, %s243_s11  ;;  %p249_p2 = scmp.lt.s32.totalorder %s243_s11, %s243_s11 }
   0x7   :  { %p250_p3 = por %p249_p2, %p248_p1 }
   0x9   :  { %p251_p4 = pnand %p250_p3, %p244_p0 }
   0xb   :  { %254 = shalt.err (!%p251_p4)
}
   0xc   :  { %s302_s12 = smov 128   ;;  %s303_s13 = smov 8  }
   0xd   :  { %21 = dma.hbm_to_vmem [thread:$0]  %s339_s0, 5504, %s16_s10, [#allocation3], %s302_s12, %s302_s12, %s303_s13  }
   0xe   :  { %s304_s16 = smov [#allocation5]  }
   0xf   :  { %s27_s17 = sshll.u32 %s304_s16, 4  ;;  %s28_s17 = int_to_ptr.vmem [resolvable:$true] %s27_s17 }
  0x10   :  { %s263_s18 = scalar_lea.vmem %s28_s17, 5504  ;;  %p268_p6 = scmp.lt.s32.totalorder %s28_s17, %s28_s17 }
  0x11   :  { %p264_p5 = scmp.ne.s32.totalorder %s28_s17, %s263_s18  ;;  %p269_p7 = scmp.lt.s32.totalorder %s263_s18, %s263_s18 }
  0x13   :  { %p270_p8 = por %p269_p7, %p268_p6 }
  0x15   :  { %p271_p9 = pnand %p270_p8, %p264_p5 }
  0x17   :  { %274 = shalt.err (!%p271_p9)
}
  0x18   :  { %33 = dma.hbm_to_vmem [thread:$0]  %s340_s1, 5504, %s28_s17, [#allocation6], %s302_s12, %s302_s12, %s303_s13  }
  0x19   :  { %295 = dma.done.wait [#allocation3], 5504  }
  0x1a   :  { %296 = vsyncadd [#allocation3], 4294961792 }
  0x1b   :  { %297 = dma.done.wait [#allocation6], 5504  }
  0x1c   :  { %298 = vsyncadd [#allocation6], 4294961792  ;;  %v40_v0 = vld [vmem:[#allocation2] sm:$0xff]  ;;  %v83_v1 = vld [vmem:[#allocation5] sm:$0xff]  ;;  %s305_s0 = smov [#allocation7]  }
  0x1d   :  { %v41_v2 = vld [vmem:[#allocation2 + $0x8] sm:$0xff]  ;;  %v126_v3 = vadd.f32 %v83_v1, %v40_v0  ;;  %v84_v4 = vld [vmem:[#allocation5 + $0x8] sm:$0xff]  ;;  %v42_v5 = vld [vmem:[#allocation2 + $0x10] sm:$0xff]  ;;  %s217_s1 = sshll.u32 %s305_s0, 4  ;;  %s218_s1 = int_to_ptr.vmem [resolvable:$true] %s217_s1 }
  0x1e   :  { %v85_v6 = vld [vmem:[#allocation5 + $0x10] sm:$0xff]  ;;  %v127_v7 = vadd.f32 %v84_v4, %v41_v2  ;;  %v43_v9 = vld [vmem:[#allocation2 + $0x18] sm:$0xff]  ;;  %v86_v10 = vld [vmem:[#allocation5 + $0x18] sm:$0xff]  ;;  %s275_s21 = scalar_lea.vmem %s218_s1, 5504  ;;  %p280_p11 = scmp.lt.s32.totalorder %s218_s1, %s218_s1 }
  0x1f   :  { %v128_v8 = vadd.f32 %v85_v6, %v42_v5  ;;  %v44_v11 = vld [vmem:[#allocation2 + $0x20] sm:$0xff]  ;;  %169 = vst [vmem:[#allocation7] sm:$0xff] %v126_v3  ;;  %v129_v12 = vadd.f32 %v86_v10, %v43_v9  ;;  %v87_v13 = vld [vmem:[#allocation5 + $0x20] sm:$0xff]  ;;  %v45_v14 = vld [vmem:[#allocation2 + $0x28] sm:$0xff]  ;;  %p276_p10 = scmp.ne.s32.totalorder %s218_s1, %s275_s21  ;;  %p281_p12 = scmp.lt.s32.totalorder %s275_s21, %s275_s21 }
  0x20   :  { %v88_v15 = vld [vmem:[#allocation5 + $0x28] sm:$0xff]  ;;  %170 = vst [vmem:[#allocation7 + $0x8] sm:$0xff] %v127_v7  ;;  %v130_v16 = vadd.f32 %v87_v13, %v44_v11  ;;  %v46_v18 = vld [vmem:[#allocation2 + $0x30] sm:$0xff]  ;;  %v89_v19 = vld [vmem:[#allocation5 + $0x30] sm:$0xff] }
  0x21   :  { %171 = vst [vmem:[#allocation7 + $0x10] sm:$0xff] %v128_v8  ;;  %v131_v17 = vadd.f32 %v88_v15, %v45_v14  ;;  %v47_v20 = vld [vmem:[#allocation2 + $0x38] sm:$0xff]  ;;  %172 = vst [vmem:[#allocation7 + $0x18] sm:$0xff] %v129_v12  ;;  %v132_v21 = vadd.f32 %v89_v19, %v46_v18  ;;  %v90_v22 = vld [vmem:[#allocation5 + $0x38] sm:$0xff]  ;;  %p282_p13 = por %p281_p12, %p280_p11 }
  0x22   :  { %v48_v23 = vld [vmem:[#allocation2 + $0x40] sm:$0xff]  ;;  %v91_v24 = vld [vmem:[#allocation5 + $0x40] sm:$0xff]  ;;  %173 = vst [vmem:[#allocation7 + $0x20] sm:$0xff] %v130_v16  ;;  %v133_v25 = vadd.f32 %v90_v22, %v47_v20  ;;  %v49_v27 = vld [vmem:[#allocation2 + $0x48] sm:$0xff] }
  0x23   :  { %174 = vst [vmem:[#allocation7 + $0x28] sm:$0xff] %v131_v17  ;;  %v134_v26 = vadd.f32 %v91_v24, %v48_v23  ;;  %v92_v28 = vld [vmem:[#allocation5 + $0x48] sm:$0xff]  ;;  %v50_v29 = vld [vmem:[#allocation2 + $0x50] sm:$0xff]  ;;  %175 = vst [vmem:[#allocation7 + $0x30] sm:$0xff] %v132_v21  ;;  %p283_p0 = pnand %p282_p13, %p276_p10 }
  0x24   :  { %v135_v30 = vadd.f32 %v92_v28, %v49_v27  ;;  %v93_v31 = vld [vmem:[#allocation5 + $0x50] sm:$0xff]  ;;  %v51_v32 = vld [vmem:[#allocation2 + $0x58] sm:$0xff]  ;;  %v94_v33 = vld [vmem:[#allocation5 + $0x58] sm:$0xff]  ;;  %176 = vst [vmem:[#allocation7 + $0x38] sm:$0xff] %v133_v25 }
  0x25   :  { %177 = vst [vmem:[#allocation7 + $0x40] sm:$0xff] %v134_v26  ;;  %v136_v34 = vadd.f32 %v93_v31, %v50_v29  ;;  %v137_v35 = vadd.f32 %v94_v33, %v51_v32  ;;  %v52_v36 = vld [vmem:[#allocation2 + $0x60] sm:$0xff]  ;;  %v95_v37 = vld [vmem:[#allocation5 + $0x60] sm:$0xff]  ;;  %v53_v38 = vld [vmem:[#allocation2 + $0x68] sm:$0xff] }
  0x26   :  { %178 = vst [vmem:[#allocation7 + $0x48] sm:$0xff] %v135_v30  ;;  %v138_v39 = vadd.f32 %v95_v37, %v52_v36  ;;  %v96_v40 = vld [vmem:[#allocation5 + $0x68] sm:$0xff]  ;;  %v54_v41 = vld [vmem:[#allocation2 + $0x70] sm:$0xff]  ;;  %v97_v42 = vld [vmem:[#allocation5 + $0x70] sm:$0xff] }
  0x27   :  { %179 = vst [vmem:[#allocation7 + $0x50] sm:$0xff] %v136_v34  ;;  %180 = vst [vmem:[#allocation7 + $0x58] sm:$0xff] %v137_v35  ;;  %v139_v43 = vadd.f32 %v96_v40, %v53_v38  ;;  %v140_v44 = vadd.f32 %v97_v42, %v54_v41  ;;  %v55_v45 = vld [vmem:[#allocation2 + $0x78] sm:$0xff]  ;;  %v98_v46 = vld [vmem:[#allocation5 + $0x78] sm:$0xff] }
  0x28   :  { %v56_v47 = vld [vmem:[#allocation2 + $0x80] sm:$0xff]  ;;  %181 = vst [vmem:[#allocation7 + $0x60] sm:$0xff] %v138_v39  ;;  %v141_v48 = vadd.f32 %v98_v46, %v55_v45  ;;  %v99_v49 = vld [vmem:[#allocation5 + $0x80] sm:$0xff]  ;;  %v57_v50 = vld [vmem:[#allocation2 + $0x88] sm:$0xff] }
  0x29   :  { %v100_v51 = vld [vmem:[#allocation5 + $0x88] sm:$0xff]  ;;  %182 = vst [vmem:[#allocation7 + $0x68] sm:$0xff] %v139_v43  ;;  %183 = vst [vmem:[#allocation7 + $0x70] sm:$0xff] %v140_v44  ;;  %v142_v52 = vadd.f32 %v99_v49, %v56_v47  ;;  %v58_v54 = vld [vmem:[#allocation2 + $0x90] sm:$0xff] }
  0x2a   :  { %v143_v53 = vadd.f32 %v100_v51, %v57_v50  ;;  %v101_v55 = vld [vmem:[#allocation5 + $0x90] sm:$0xff]  ;;  %v59_v56 = vld [vmem:[#allocation2 + $0x98] sm:$0xff]  ;;  %184 = vst [vmem:[#allocation7 + $0x78] sm:$0xff] %v141_v48  ;;  %v102_v58 = vld [vmem:[#allocation5 + $0x98] sm:$0xff] }
  0x2b   :  { %v144_v57 = vadd.f32 %v101_v55, %v58_v54  ;;  %v60_v59 = vld [vmem:[#allocation2 + $0xa0] sm:$0xff]  ;;  %v103_v60 = vld [vmem:[#allocation5 + $0xa0] sm:$0xff]  ;;  %185 = vst [vmem:[#allocation7 + $0x80] sm:$0xff] %v142_v52  ;;  %v145_v61 = vadd.f32 %v102_v58, %v59_v56  ;;  %v61_v63 = vld [vmem:[#allocation2 + $0xa8] sm:$0xff] }
  0x2c   :  { %186 = vst [vmem:[#allocation7 + $0x88] sm:$0xff] %v143_v53  ;;  %v146_v62 = vadd.f32 %v103_v60, %v60_v59  ;;  %v104_v0 = vld [vmem:[#allocation5 + $0xa8] sm:$0xff]  ;;  %v62_v1 = vld [vmem:[#allocation2 + $0xb0] sm:$0xff]  ;;  %v105_v3 = vld [vmem:[#allocation5 + $0xb0] sm:$0xff] }
  0x2d   :  { %187 = vst [vmem:[#allocation7 + $0x90] sm:$0xff] %v144_v57  ;;  %v147_v2 = vadd.f32 %v104_v0, %v61_v63  ;;  %v63_v4 = vld [vmem:[#allocation2 + $0xb8] sm:$0xff]  ;;  %v106_v5 = vld [vmem:[#allocation5 + $0xb8] sm:$0xff]  ;;  %188 = vst [vmem:[#allocation7 + $0x98] sm:$0xff] %v145_v61  ;;  %v148_v6 = vadd.f32 %v105_v3, %v62_v1 }
  0x2e   :  { %189 = vst [vmem:[#allocation7 + $0xa0] sm:$0xff] %v146_v62  ;;  %v149_v7 = vadd.f32 %v106_v5, %v63_v4  ;;  %v64_v8 = vld [vmem:[#allocation2 + $0xc0] sm:$0xff]  ;;  %v107_v9 = vld [vmem:[#allocation5 + $0xc0] sm:$0xff]  ;;  %v65_v10 = vld [vmem:[#allocation2 + $0xc8] sm:$0xff] }
  0x2f   :  { %190 = vst [vmem:[#allocation7 + $0xa8] sm:$0xff] %v147_v2  ;;  %v150_v11 = vadd.f32 %v107_v9, %v64_v8  ;;  %v108_v12 = vld [vmem:[#allocation5 + $0xc8] sm:$0xff]  ;;  %v66_v13 = vld [vmem:[#allocation2 + $0xd0] sm:$0xff]  ;;  %v109_v14 = vld [vmem:[#allocation5 + $0xd0] sm:$0xff] }
  0x30   :  { %191 = vst [vmem:[#allocation7 + $0xb0] sm:$0xff] %v148_v6  ;;  %192 = vst [vmem:[#allocation7 + $0xb8] sm:$0xff] %v149_v7  ;;  %v151_v15 = vadd.f32 %v108_v12, %v65_v10  ;;  %v152_v16 = vadd.f32 %v109_v14, %v66_v13  ;;  %v67_v17 = vld [vmem:[#allocation2 + $0xd8] sm:$0xff]  ;;  %v110_v18 = vld [vmem:[#allocation5 + $0xd8] sm:$0xff] }
  0x31   :  { %v68_v19 = vld [vmem:[#allocation2 + $0xe0] sm:$0xff]  ;;  %193 = vst [vmem:[#allocation7 + $0xc0] sm:$0xff] %v150_v11  ;;  %v153_v20 = vadd.f32 %v110_v18, %v67_v17  ;;  %v111_v21 = vld [vmem:[#allocation5 + $0xe0] sm:$0xff]  ;;  %v69_v22 = vld [vmem:[#allocation2 + $0xe8] sm:$0xff] }
  0x32   :  { %v112_v23 = vld [vmem:[#allocation5 + $0xe8] sm:$0xff]  ;;  %194 = vst [vmem:[#allocation7 + $0xc8] sm:$0xff] %v151_v15  ;;  %195 = vst [vmem:[#allocation7 + $0xd0] sm:$0xff] %v152_v16  ;;  %v154_v24 = vadd.f32 %v111_v21, %v68_v19  ;;  %v70_v26 = vld [vmem:[#allocation2 + $0xf0] sm:$0xff] }
  0x33   :  { %v155_v25 = vadd.f32 %v112_v23, %v69_v22  ;;  %v113_v27 = vld [vmem:[#allocation5 + $0xf0] sm:$0xff]  ;;  %v71_v28 = vld [vmem:[#allocation2 + $0xf8] sm:$0xff]  ;;  %196 = vst [vmem:[#allocation7 + $0xd8] sm:$0xff] %v153_v20  ;;  %v114_v30 = vld [vmem:[#allocation5 + $0xf8] sm:$0xff] }
  0x34   :  { %v156_v29 = vadd.f32 %v113_v27, %v70_v26  ;;  %v72_v31 = vld [vmem:[#allocation2 + $0x100] sm:$0xff]  ;;  %v115_v32 = vld [vmem:[#allocation5 + $0x100] sm:$0xff]  ;;  %197 = vst [vmem:[#allocation7 + $0xe0] sm:$0xff] %v154_v24  ;;  %v157_v33 = vadd.f32 %v114_v30, %v71_v28  ;;  %v73_v35 = vld [vmem:[#allocation2 + $0x108] sm:$0xff] }
  0x35   :  { %198 = vst [vmem:[#allocation7 + $0xe8] sm:$0xff] %v155_v25  ;;  %v158_v34 = vadd.f32 %v115_v32, %v72_v31  ;;  %v116_v36 = vld [vmem:[#allocation5 + $0x108] sm:$0xff]  ;;  %v74_v37 = vld [vmem:[#allocation2 + $0x110] sm:$0xff]  ;;  %v117_v39 = vld [vmem:[#allocation5 + $0x110] sm:$0xff] }
  0x36   :  { %199 = vst [vmem:[#allocation7 + $0xf0] sm:$0xff] %v156_v29  ;;  %v159_v38 = vadd.f32 %v116_v36, %v73_v35  ;;  %v75_v40 = vld [vmem:[#allocation2 + $0x118] sm:$0xff]  ;;  %v118_v41 = vld [vmem:[#allocation5 + $0x118] sm:$0xff]  ;;  %200 = vst [vmem:[#allocation7 + $0xf8] sm:$0xff] %v157_v33  ;;  %v160_v42 = vadd.f32 %v117_v39, %v74_v37 }
  0x37   :  { %201 = vst [vmem:[#allocation7 + $0x100] sm:$0xff] %v158_v34  ;;  %v161_v43 = vadd.f32 %v118_v41, %v75_v40  ;;  %v76_v44 = vld [vmem:[#allocation2 + $0x120] sm:$0xff]  ;;  %v119_v45 = vld [vmem:[#allocation5 + $0x120] sm:$0xff]  ;;  %v77_v46 = vld [vmem:[#allocation2 + $0x128] sm:$0xff] }
  0x38   :  { %202 = vst [vmem:[#allocation7 + $0x108] sm:$0xff] %v159_v38  ;;  %v162_v47 = vadd.f32 %v119_v45, %v76_v44  ;;  %v120_v48 = vld [vmem:[#allocation5 + $0x128] sm:$0xff]  ;;  %v78_v49 = vld [vmem:[#allocation2 + $0x130] sm:$0xff]  ;;  %v121_v50 = vld [vmem:[#allocation5 + $0x130] sm:$0xff] }
  0x39   :  { %203 = vst [vmem:[#allocation7 + $0x110] sm:$0xff] %v160_v42  ;;  %204 = vst [vmem:[#allocation7 + $0x118] sm:$0xff] %v161_v43  ;;  %v163_v51 = vadd.f32 %v120_v48, %v77_v46  ;;  %v164_v52 = vadd.f32 %v121_v50, %v78_v49  ;;  %v79_v53 = vld [vmem:[#allocation2 + $0x138] sm:$0xff]  ;;  %v122_v54 = vld [vmem:[#allocation5 + $0x138] sm:$0xff] }
  0x3a   :  { %v80_v55 = vld [vmem:[#allocation2 + $0x140] sm:$0xff]  ;;  %205 = vst [vmem:[#allocation7 + $0x120] sm:$0xff] %v162_v47  ;;  %v165_v56 = vadd.f32 %v122_v54, %v79_v53  ;;  %v123_v57 = vld [vmem:[#allocation5 + $0x140] sm:$0xff]  ;;  %v81_v58 = vld [vmem:[#allocation2 + $0x148] sm:$0xff] }
  0x3b   :  { %v124_v59 = vld [vmem:[#allocation5 + $0x148] sm:$0xff]  ;;  %206 = vst [vmem:[#allocation7 + $0x128] sm:$0xff] %v163_v51  ;;  %207 = vst [vmem:[#allocation7 + $0x130] sm:$0xff] %v164_v52  ;;  %v166_v60 = vadd.f32 %v123_v57, %v80_v55  ;;  %v82_v62 = vld [vmem:[#allocation2 + $0x150] sm:$0xff] }
  0x3c   :  { %v167_v61 = vadd.f32 %v124_v59, %v81_v58  ;;  %v125_v63 = vld [vmem:[#allocation5 + $0x150] sm:$0xff]  ;;  %208 = vst [vmem:[#allocation7 + $0x138] sm:$0xff] %v165_v56 }
  0x3d   :  { %v168_v0 = vadd.f32 %v125_v63, %v82_v62  ;;  %209 = vst [vmem:[#allocation7 + $0x140] sm:$0xff] %v166_v60 }
  0x3e   :  { %210 = vst [vmem:[#allocation7 + $0x148] sm:$0xff] %v167_v61 }
  0x3f   :  { %211 = vst [vmem:[#allocation7 + $0x150] sm:$0xff] %v168_v0 }
  0x40   :  { %286 = shalt.err (!%p283_p0)
}
  0x41   :  { %223 = dma.vmem_to_hbm [thread:$0]  %s218_s1, 5504, %s341_s2, [#allocation4], %s302_s12, %s302_s12, %s303_s13  }
  0x42   :  { %299 = dma.done.wait [#allocation4], 5504  }
  0x43   :  { %300 = vsyncadd [#allocation4], 4294961792 }
  0x44   :  { %227 = vsyncpa [#allocation3], 1 }
  0x45   :  { %228 = vsyncpa [#allocation6], 1 }
  0x46   :  { %229 = vsyncpa [#allocation4], 1 }

</bundles_post_ra>
